<compile_context>
chip_gen: v5e
topology: v5e:2x2
jax: 0.10.0
libtpu: 0.0.40
codegen_flags: <defaults>
</compile_context>

<pallas_src>
import math
import functools

import jax
import jax.numpy as jnp
from jax import lax
from jax.experimental import pallas as pl
from jax.experimental.pallas import tpu as pltpu


def make_positional_encoding(max_len, d_model, dtype=jnp.float32):
    """Deterministic PE buffer, identical math to the PyTorch __init__."""
    position = jnp.arange(max_len, dtype=jnp.float32)[:, None]              # (max_len, 1)
    div_term = jnp.exp(
        jnp.arange(0, d_model, 2, dtype=jnp.float32) * -(math.log(10000.0) / d_model)
    )                                                                        # (d_model//2,)
    pe = jnp.zeros((max_len, d_model), dtype=jnp.float32)
    pe = pe.at[:, 0::2].set(jnp.sin(position * div_term))
    pe = pe.at[:, 1::2].set(jnp.cos(position * div_term))
    return pe.astype(dtype)


def _wrap_i32(v):
    """Wrap a uint32 literal to the int32 value with the same bit pattern."""
    v &= 0xFFFFFFFF
    return v - (1 << 32) if v >= (1 << 31) else v


_MIX1 = _wrap_i32(0x85EBCA6B)
_MIX2 = _wrap_i32(0xC2B2AE35)


def _lsr32(h, k):
    """Logical right shift for int32 (arithmetic shift + mask of sign-extended bits)."""
    return jnp.bitwise_and(jnp.right_shift(h, k), (1 << (32 - k)) - 1)


def _pe_dropout_kernel(seed_ref, x_ref, pe_ref, o_ref, *, p, train, total_lanes):
    # seed_ref : SMEM (1,) int32   (scalar prefetch)
    # x_ref    : VMEM (rt, lt)     flattened (batch-rows, seq*d_model lanes)
    # pe_ref   : VMEM (1,  lt)     PE slice, already scaled by 1/20
    # o_ref    : VMEM (rt, lt)
    x = x_ref[...]
    y = x + pe_ref[...].astype(x.dtype)            # sublane broadcast over batch rows

    if train and p > 0.0:
        keep = 1.0 - p
        rt, lt = y.shape
        j = pl.program_id(0)                        # lane-block (outer grid axis)
        i = pl.program_id(1)                        # batch-row block (inner grid axis)
        rows = lax.broadcasted_iota(jnp.int32, (rt, lt), 0) + i * rt
        cols = lax.broadcasted_iota(jnp.int32, (rt, lt), 1) + j * lt
        # Counter-based hash (murmur3 fmix32) -> decorrelated per-element bits.
        h = rows * jnp.int32(total_lanes) + cols
        h = h ^ seed_ref[0]
        h = h ^ _lsr32(h, 16)
        h = h * _MIX1
        h = h ^ _lsr32(h, 13)
        h = h * _MIX2
        h = h ^ _lsr32(h, 16)
        u = jnp.bitwise_and(h, 0x7FFFFFFF)          # uniform int in [0, 2^31)
        threshold = int(keep * 2147483648.0)        # keep * 2^31 (static)
        keep_mask = u < threshold
        # Inverted dropout: keep/(1-p) scaling, scalar zero for the drop branch.
        y = jnp.where(keep_mask, y * (1.0 / keep), 0.0)

    o_ref[...] = y.astype(o_ref.dtype)


def _largest_divisor_tile(total, unit, cap):
    """Largest multiple of `unit` that divides `total` and is <= cap (else `total`)."""
    if total <= cap:
        return total
    if total % unit:
        return total
    t = (cap // unit) * unit
    while t >= unit:
        if total % t == 0:
            return t
        t -= unit
    return total


def positional_encoding_forward(x, pe, *, p=0.5, train=False, seed=0,
                                row_tile=None, lane_tile=None):
    """x: (B, S, D); pe: (max_len, D). Returns dropout(x + pe[:S]/20), shape (B, S, D)."""
    B, S, D = x.shape
    if train:
        assert 0.0 <= p < 1.0, "dropout p must be in [0, 1) in train mode"
    N = S * D
    itemsize = jnp.dtype(x.dtype).itemsize

    # Fold the /20 scale into the small PE slice once (outside the kernel), flatten
    # everything to a lane-dense 2D layout.
    pe_s = (pe[:S].astype(jnp.float32) * (1.0 / 20.0)).astype(x.dtype).reshape(1, N)
    x2 = x.reshape(B, N)

    # Tile selection: big lane-dense blocks (multiples of 128 lanes), whole batch
    # per block when small. ~2 MiB per x block keeps the double-buffered footprint
    # ~10 MiB -> fits every generation's scoped VMEM.
    if row_tile is None:
        row_tile = B if B <= 8 else _largest_divisor_tile(B, 8, 64)
    if lane_tile is None:
        cap = max(128, (2 * 1024 * 1024) // max(1, row_tile * itemsize))
        cap = max(128, (cap // 128) * 128)
        lane_tile = _largest_divisor_tile(N, 128, cap)

    # Lanes on the outer axis, batch rows inner: the PE block index only depends on
    # the outer axis, so its DMA is skipped while sweeping batch rows.
    grid = (N // lane_tile, B // row_tile)

    kernel = functools.partial(_pe_dropout_kernel, p=p, train=train, total_lanes=N)
    seed_arr = jnp.array([seed], dtype=jnp.int32)

    out2 = pl.pallas_call(
        kernel,
        out_shape=jax.ShapeDtypeStruct((B, N), x.dtype),
        grid_spec=pltpu.PrefetchScalarGridSpec(
            num_scalar_prefetch=1,
            grid=grid,
            in_specs=[
                pl.BlockSpec((row_tile, lane_tile), lambda j, i, seed: (i, j)),  # x
                pl.BlockSpec((1, lane_tile), lambda j, i, seed: (0, j)),         # pe
            ],
            out_specs=pl.BlockSpec((row_tile, lane_tile), lambda j, i, seed: (i, j)),
        ),
        compiler_params=pltpu.CompilerParams(
            dimension_semantics=("parallel", "arbitrary"),
            vmem_limit_bytes=32 * 1024 * 1024,
        ),
    )(seed_arr, x2, pe_s)

    return out2.reshape(B, S, D)


if __name__ == "__main__":
    # Small shapes consistent with the module: (batch, seq, d_model)
    B, S, D = 2, 8, 32
    MAX_LEN = 5000

    key = jax.random.PRNGKey(0)
    x = jax.random.normal(key, (B, S, D), dtype=jnp.float32)
    pe = make_positional_encoding(MAX_LEN, D, dtype=jnp.float32)

    # Eval-mode forward (dropout = identity), deterministic.
    out = positional_encoding_forward(x, pe, p=0.5, train=False)
    out = jax.block_until_ready(out)

    ref = x + pe[None, :S, :] / 20.0
    assert out.shape == (B, S, D)
    assert jnp.allclose(out, ref, atol=1e-5, rtol=1e-5)

    # Train-mode path: in-kernel inverted dropout via a portable counter hash.
    # TODO(synk): torch's dropout RNG stream cannot be reproduced bit-exactly; only the
    # distributional semantics (Bernoulli keep + 1/(1-p) scaling) are matched.
    p = 0.5
    out_train = positional_encoding_forward(x, pe, p=p, train=True, seed=123)
    out_train = jax.block_until_ready(out_train)
    assert out_train.shape == (B, S, D)
    keep = 1.0 - p
    # Every kept element equals ref / keep; dropped elements are exactly 0.
    match = jnp.isclose(out_train, ref / keep, atol=1e-5, rtol=1e-5) | (out_train == 0.0)
    assert bool(jnp.all(match))
    frac_kept = float(jnp.mean((out_train != 0.0).astype(jnp.float32)))
    assert 0.2 < frac_kept < 0.8  # deterministic given fixed seed; sanity only

    print("KERNEL_OK")
</pallas_src>

<mosaic_0001>
module attributes {stable_mosaic.version = 11 : i64} {
  func.func @_pe_dropout_kernel(%arg0: i32, %arg1: i32, %arg2: memref<1xi32, #tpu.memory_space<smem>>, %arg3: memref<2x256xf32, #tpu.memory_space<vmem>>, %arg4: memref<1x256xf32, #tpu.memory_space<vmem>>, %arg5: memref<2x256xf32, #tpu.memory_space<vmem>>) attributes {dimension_semantics = [#tpu.dimension_semantics<parallel>, #tpu.dimension_semantics<arbitrary>], iteration_bounds = array<i64: 1, 1>, scalar_prefetch = 1 : i64, scratch_operands = 0 : i64, tpu.core_type = #tpu.core_type<tc>, window_params = [{transform_indices = @transform_0, window_bounds = array<i64: 2, 256>}, {transform_indices = @transform_1, window_bounds = array<i64: 1, 256>}, {transform_indices = @transform_2, window_bounds = array<i64: 2, 256>}]} {
    %c0 = arith.constant 0 : index
    %c0_0 = arith.constant 0 : index
    %0 = vector.load %arg3[%c0, %c0_0] : memref<2x256xf32, #tpu.memory_space<vmem>>, vector<2x256xf32>
    %c0_1 = arith.constant 0 : index
    %c0_2 = arith.constant 0 : index
    %1 = vector.load %arg4[%c0_1, %c0_2] : memref<1x256xf32, #tpu.memory_space<vmem>>, vector<1x256xf32>
    %2 = vector.broadcast %1 : vector<1x256xf32> to vector<2x256xf32>
    %3 = arith.addf %0, %2 : vector<2x256xf32>
    %c0_3 = arith.constant 0 : index
    %c0_4 = arith.constant 0 : index
    %4 = vector.load %arg5[%c0_3, %c0_4] : memref<2x256xf32, #tpu.memory_space<vmem>>, vector<2x256xf32>
    tpu.vector_store %arg5[%c0_3, %c0_4], %3 {strides = array<i32>} : memref<2x256xf32, #tpu.memory_space<vmem>>, vector<2x256xf32>,
    return
  }
  func.func @transform_0(%arg0: i32, %arg1: i32, %arg2: memref<1xi32, #tpu.memory_space<smem>>) -> (i32, i32) {
    %c0_i32 = arith.constant 0 : i32
    return %arg1, %arg0 : i32, i32
  }
  func.func @transform_1(%arg0: i32, %arg1: i32, %arg2: memref<1xi32, #tpu.memory_space<smem>>) -> (i32, i32) {
    %c0_i32 = arith.constant 0 : i32
    %c0_i32_0 = arith.constant 0 : i32
    return %c0_i32, %arg0 : i32, i32
  }
  func.func @transform_2(%arg0: i32, %arg1: i32, %arg2: memref<1xi32, #tpu.memory_space<smem>>) -> (i32, i32) {
    %c0_i32 = arith.constant 0 : i32
    return %arg1, %arg0 : i32, i32
  }
}

</mosaic_0001>

<bundles_post_ra>
// kernel: tpu_custom_call.1
= control target key start
LH: loop header
LB: loop body
LE: loop exit
PB: predicated region body
PF: predicated region fallthrough
CT: control target
= control target key end

     0   :  { %9 = vsyncpa [#allocation5], 0  ;;  %s141_s0 = inlined_call_operand.<no memory space> [shape: s32[1], index: 0, kind: input, shape index: {}]   ;;  %s142_s1 = inlined_call_operand.hbm [shape: f32[2,256], index: 1, kind: input, shape index: {}]   ;;  %s143_s2 = inlined_call_operand.vmem [shape: f32[1,256], index: 2, kind: input, shape index: {}]   ;;  %s144_s3 = inlined_call_operand.hbm [shape: f32[2,256], index: 3, kind: output, shape index: {}]  }
   0x1   :  { %10 = vsyncpa [#allocation6], 0  ;;  %s16_s14 = sshll.u32 %s142_s1, 4  ;;  %s110_s15 = smov [#allocation4]   ;;  %s17_s14 = int_to_ptr.hbm [resolvable:$true] %s16_s14 }
   0x2   :  { %s18_s16 = sshll.u32 %s110_s15, 4  ;;  %s19_s16 = int_to_ptr.vmem [resolvable:$true] %s18_s16 }
   0x3   :  { %21 = dma.hbm_to_vmem [thread:$0]  %s17_s14, 64, %s19_s16, [#allocation5]  }
   0x4   :  { %106 = dma.done.wait [#allocation5], 64  }
   0x5   :  { %107 = vsyncadd [#allocation5], 4294967232  ;;  %v29_v0 = vld [vmem:[%s143_s2] sm:$0x3]  ;;  %vm34_vm0 = vcmask 1041408   ;;  %s111_s18 = smov [#allocation7]  }
   0x6   :  { %v31_v1 = vperm.slane %v29_v0, 0  ;;  %v32_v2 = vperm.slane %v29_v0, 1  ;;  %v28_v3 = vld [vmem:[#allocation4] sm:$0xf]  ;;  %s44_s19 = sshll.u32 %s111_s18, 4  ;;  %s46_s21 = sshll.u32 %s144_s3, 4  ;;  %s45_s19 = int_to_ptr.vmem [resolvable:$true] %s44_s19  ;;  %s47_s21 = int_to_ptr.hbm [resolvable:$true] %s46_s21 }
   0x8   :  { %v33_v4 = vrot.slane %v32_v2, 6 }
   0xa   :  { %v35_v5 = vsel %vm34_vm0, %v31_v1, %v33_v4 }
   0xb   :  { %v37_v6 = vadd.f32 %v35_v5, %v28_v3 }
   0xd   :  { %38 = vst [vmem:[#allocation7] sm:$0xf] %v37_v6 }
   0xe   :  { %49 = dma.vmem_to_hbm [thread:$0]  %s45_s19, 64, %s47_s21, [#allocation6]  }
   0xf   :  { %108 = dma.done.wait [#allocation6], 64  }
  0x10   :  { %109 = vsyncadd [#allocation6], 4294967232 }
  0x11   :  { %54 = vsyncpa [#allocation5], 1 }
  0x12   :  { %55 = vsyncpa [#allocation6], 1 }

</bundles_post_ra>
